<compile_context>
chip_gen: v5e
topology: v5e:2x2
jax: 0.10.0
libtpu: 0.0.40
codegen_flags: <defaults>
</compile_context>

<pallas_src>
import math

import jax
import jax.numpy as jnp
from jax import lax
from jax.experimental import pallas as pl
from jax.experimental.pallas import tpu as pltpu

EPS = 1e-5  # F.layer_norm default eps


# --------------------------------------------------------------------------
# Kernels
# --------------------------------------------------------------------------
def _layernorm_kernel(x_ref, g_ref, o_ref):
    # x_ref: (tile_rows, dim); g_ref: (1, dim). dim is the full (untiled) axis.
    x = x_ref[...].astype(jnp.float32)
    d_inv = 1.0 / x_ref.shape[-1]                      # static scalar
    s = jnp.sum(x, axis=-1, keepdims=True)
    sq = jnp.sum(x * x, axis=-1, keepdims=True)
    mean = s * d_inv
    var = sq * d_inv - mean * mean                     # one-pass variance
    inv = lax.rsqrt(var + EPS)                         # EUP (free slot)
    g = g_ref[...].astype(jnp.float32)
    o_ref[...] = ((x - mean) * inv * g).astype(o_ref.dtype)


def _layernorm_beta_kernel(x_ref, g_ref, b_ref, o_ref):
    # Same as above but with a (generally non-zero) bias.
    x = x_ref[...].astype(jnp.float32)
    d_inv = 1.0 / x_ref.shape[-1]
    s = jnp.sum(x, axis=-1, keepdims=True)
    sq = jnp.sum(x * x, axis=-1, keepdims=True)
    mean = s * d_inv
    var = sq * d_inv - mean * mean
    inv = lax.rsqrt(var + EPS)
    g = g_ref[...].astype(jnp.float32)
    b = b_ref[...].astype(jnp.float32)
    o_ref[...] = ((x - mean) * inv * g + b).astype(o_ref.dtype)


# --------------------------------------------------------------------------
# Tile sizing
# --------------------------------------------------------------------------
def _round_up(x, m):
    return ((x + m - 1) // m) * m


def _pick_tile_rows(rows, dim, in_dtype, out_dtype,
                    budget_bytes=8 << 20, max_block_bytes=4 << 20):
    """Largest sublane-aligned row tile whose total VMEM footprint
    (double-buffered in+out blocks + in-kernel f32 intermediates) fits a
    conservative budget, with the input block capped at ~4 MiB (HBM roofline
    plateaus at 1-4 MiB blocks) and the grid shaped for v7x megacore."""
    in_b = jnp.dtype(in_dtype).itemsize
    out_b = jnp.dtype(out_dtype).itemsize
    # sublane packing: 8 rows for f32, 16 for bf16, 32 for int8/fp8
    mult = 8 * max(1, 4 // in_b)
    rows_rounded = _round_up(rows, mult)

    # Per-row VMEM cost:
    #   2x double-buffered input + output blocks, plus ~2 f32 temporaries the
    #   body materializes (x_f32 and the centered/scaled intermediate).
    per_row = dim * (in_b + out_b) * 2 + dim * 4 * 2
    tr = max(budget_bytes // max(per_row, 1), mult)

    # Byte-based cap on the input block itself (replaces the old 1024-row cap).
    tr = min(tr, max(max_block_bytes // max(dim * in_b, 1), mult))

    # No point in a tile larger than the (sublane-rounded) row count.
    tr = min(tr, rows_rounded)

    # Grid shaping for v7x: aim for >=4 grid steps and an even step count so
    # each of the two TensorCores gets >=2 balanced tiles (per-core DMA
    # prefetch/compute overlap, no 1-vs-2 imbalance).
    if rows > mult:
        n_steps = max(pl.cdiv(rows, max((tr // mult) * mult, mult)), 2)
        target = max(4, _round_up(n_steps, 2))
        target = min(target, pl.cdiv(rows_rounded, mult))  # can't exceed #min-tiles
        tr = min(tr, _round_up(pl.cdiv(rows_rounded, target), mult))

    return max((tr // mult) * mult, mult)


# --------------------------------------------------------------------------
# Wrapper
# --------------------------------------------------------------------------
def t5_layer_norm(x, gamma, beta=None, *, tile_rows=None,
                  vmem_limit_bytes=32 << 20):
    """LayerNorm over the last axis of x (F.layer_norm semantics).

    beta=None skips the bias entirely (the module registers beta as a zero
    buffer, so the add is dead work and an extra resident DMA).
    NOTE: real model dims (768/1024/4096/...) are lane-dense (multiple of 128);
    other dims still lower correctly but pay masked-store cost per tile.
    """
    orig_shape = x.shape
    dim = orig_shape[-1]
    rows = math.prod(orig_shape[:-1]) if len(orig_shape) > 1 else 1

    x2 = x.reshape(rows, dim)
    g2 = gamma.reshape(1, dim)

    tr = tile_rows if tile_rows is not None else _pick_tile_rows(
        rows, dim, x.dtype, x.dtype)
    grid = (pl.cdiv(rows, tr),)  # boundary block masked by Pallas, no padding

    inputs = [x2, g2]
    in_specs = [
        pl.BlockSpec((tr, dim), lambda i: (i, 0)),
        pl.BlockSpec((1, dim), lambda i: (0, 0)),   # gamma stays resident
    ]
    kernel = _layernorm_kernel
    if beta is not None:
        inputs.append(beta.reshape(1, dim))
        in_specs.append(pl.BlockSpec((1, dim), lambda i: (0, 0)))
        kernel = _layernorm_beta_kernel

    out2 = pl.pallas_call(
        kernel,
        out_shape=jax.ShapeDtypeStruct((rows, dim), x.dtype),
        grid_spec=pltpu.PrefetchScalarGridSpec(
            num_scalar_prefetch=0,
            grid=grid,
            in_specs=in_specs,
            out_specs=pl.BlockSpec((tr, dim), lambda i: (i, 0)),
        ),
        compiler_params=pltpu.CompilerParams(
            dimension_semantics=("parallel",),
            vmem_limit_bytes=vmem_limit_bytes,
        ),
    )(*inputs)

    return out2.reshape(orig_shape)


def pre_norm(x, gamma, fn, beta=None, **kwargs):
    """PreNorm.forward: fn(norm(x), **kwargs)."""
    # TODO(synk): PreNorm's wrapped `fn` is an arbitrary sub-module; the
    # largest remaining win is fusing this norm into `fn`'s first matmul tile
    # (attention/MLP LHS) to avoid the HBM round-trip, but that requires
    # knowledge of `fn`'s kernel, so it is applied here as a plain JAX
    # callable after the norm kernel, not fused.
    return fn(t5_layer_norm(x, gamma, beta), **kwargs)


# --------------------------------------------------------------------------
# Self-test
# --------------------------------------------------------------------------
def _reference_layer_norm(x, gamma, beta):
    mean = jnp.mean(x, axis=-1, keepdims=True)
    var = jnp.mean((x - mean) ** 2, axis=-1, keepdims=True)
    return (x - mean) / jnp.sqrt(var + EPS) * gamma + beta


if __name__ == "__main__":
    batch, seq, hidden = 2, 8, 32

    key = jax.random.PRNGKey(0)
    x = jax.random.normal(key, (batch, seq, hidden), dtype=jnp.float32)

    # Deterministic parameter init matching the module's __init__:
    # gamma = ones(dim) (nn.Parameter), beta = zeros(dim) (buffer).
    gamma = jnp.ones((hidden,), dtype=jnp.float32)
    beta = jnp.zeros((hidden,), dtype=jnp.float32)

    # PreNorm with identity fn; beta (zero buffer) dropped from the kernel.
    out = pre_norm(x, gamma, fn=lambda y: y)
    out = jax.block_until_ready(out)
    ref = _reference_layer_norm(x, gamma, beta)
    assert jnp.allclose(out, ref, atol=1e-5, rtol=1e-5), "mismatch vs reference"

    # Second check: non-divisible row count (15 rows) exercises the cdiv grid
    # + masked boundary tile, and the explicit-beta kernel variant.
    key2 = jax.random.PRNGKey(1)
    x2 = jax.random.normal(key2, (3, 5, hidden), dtype=jnp.float32)
    out2 = t5_layer_norm(x2, gamma, beta)
    out2 = jax.block_until_ready(out2)
    ref2 = _reference_layer_norm(x2, gamma, beta)
    assert jnp.allclose(out2, ref2, atol=1e-5, rtol=1e-5), "mismatch (tail case)"

    print("KERNEL_OK")
</pallas_src>

<mosaic_0001>
module attributes {stable_mosaic.version = 11 : i64} {
  func.func @_layernorm_kernel(%arg0: i32, %arg1: memref<8x32xf32, #tpu.memory_space<vmem>>, %arg2: memref<1x32xf32, #tpu.memory_space<vmem>>, %arg3: memref<8x32xf32, #tpu.memory_space<vmem>>) attributes {dimension_semantics = [#tpu.dimension_semantics<parallel>], iteration_bounds = array<i64: 2>, scalar_prefetch = 0 : i64, scratch_operands = 0 : i64, tpu.core_type = #tpu.core_type<tc>, window_params = [{transform_indices = @transform_0, window_bounds = array<i64: 8, 32>}, {pipeline_mode = #tpu.pipeline_mode<synchronous>, transform_indices = @transform_1, window_bounds = array<i64: 1, 32>}, {transform_indices = @transform_2, window_bounds = array<i64: 8, 32>}]} {
    %c0 = arith.constant 0 : index
    %c0_0 = arith.constant 0 : index
    %0 = vector.load %arg1[%c0, %c0_0] : memref<8x32xf32, #tpu.memory_space<vmem>>, vector<8x32xf32>
    %cst = arith.constant dense<0.000000e+00> : vector<8xf32>
    %1 = vector.multi_reduction <add>, %0, %cst [1] : vector<8x32xf32> to vector<8xf32>
    %2 = vector.shape_cast %1 : vector<8xf32> to vector<8x1xf32>
    %3 = arith.mulf %0, %0 : vector<8x32xf32>
    %cst_1 = arith.constant dense<0.000000e+00> : vector<8xf32>
    %4 = vector.multi_reduction <add>, %3, %cst_1 [1] : vector<8x32xf32> to vector<8xf32>
    %5 = vector.shape_cast %4 : vector<8xf32> to vector<8x1xf32>
    %cst_2 = arith.constant 3.125000e-02 : f32
    %6 = vector.broadcast %cst_2 : f32 to vector<8x1xf32>
    %7 = arith.mulf %2, %6 : vector<8x1xf32>
    %cst_3 = arith.constant 3.125000e-02 : f32
    %8 = vector.broadcast %cst_3 : f32 to vector<8x1xf32>
    %9 = arith.mulf %5, %8 : vector<8x1xf32>
    %10 = arith.mulf %7, %7 : vector<8x1xf32>
    %11 = arith.subf %9, %10 : vector<8x1xf32>
    %cst_4 = arith.constant 9.99999974E-6 : f32
    %12 = vector.broadcast %cst_4 : f32 to vector<8x1xf32>
    %13 = arith.addf %11, %12 : vector<8x1xf32>
    %14 = math.rsqrt %13 : vector<8x1xf32>
    %c0_5 = arith.constant 0 : index
    %c0_6 = arith.constant 0 : index
    %15 = vector.load %arg2[%c0_5, %c0_6] : memref<1x32xf32, #tpu.memory_space<vmem>>, vector<1x32xf32>
    %16 = vector.broadcast %7 : vector<8x1xf32> to vector<8x32xf32>
    %17 = arith.subf %0, %16 : vector<8x32xf32>
    %18 = vector.broadcast %14 : vector<8x1xf32> to vector<8x32xf32>
    %19 = arith.mulf %17, %18 : vector<8x32xf32>
    %20 = vector.broadcast %15 : vector<1x32xf32> to vector<8x32xf32>
    %21 = arith.mulf %19, %20 : vector<8x32xf32>
    %c0_7 = arith.constant 0 : index
    %c0_8 = arith.constant 0 : index
    %22 = vector.load %arg3[%c0_7, %c0_8] : memref<8x32xf32, #tpu.memory_space<vmem>>, vector<8x32xf32>
    tpu.vector_store %arg3[%c0_7, %c0_8], %21 {strides = array<i32>} : memref<8x32xf32, #tpu.memory_space<vmem>>, vector<8x32xf32>,
    return
  }
  func.func @transform_0(%arg0: i32) -> (i32, i32) {
    %c0_i32 = arith.constant 0 : i32
    %c0_i32_0 = arith.constant 0 : i32
    return %arg0, %c0_i32 : i32, i32
  }
  func.func @transform_1(%arg0: i32) -> (i32, i32) {
    %c0_i32 = arith.constant 0 : i32
    %c0_i32_0 = arith.constant 0 : i32
    %c0_i32_1 = arith.constant 0 : i32
    return %c0_i32, %c0_i32_0 : i32, i32
  }
  func.func @transform_2(%arg0: i32) -> (i32, i32) {
    %c0_i32 = arith.constant 0 : i32
    %c0_i32_0 = arith.constant 0 : i32
    return %arg0, %c0_i32 : i32, i32
  }
}

</mosaic_0001>

<bundles_post_ra>
// kernel: tpu_custom_call.1
= control target key start
LH: loop header
LB: loop body
LE: loop exit
PB: predicated region body
PF: predicated region fallthrough
CT: control target
= control target key end

     0   :  { %7 = vsyncpa [#allocation3], 0  ;;  %s671_s0 = inlined_call_operand.hbm [shape: f32[16,32], index: 0, kind: input, shape index: {}]   ;;  %s672_s1 = inlined_call_operand.hbm [shape: f32[1,32], index: 1, kind: input, shape index: {}]   ;;  %s673_s2 = inlined_call_operand.hbm [shape: f32[16,32], index: 2, kind: output, shape index: {}]  }
   0x1   :  { %9 = vsyncpa [#allocation3 + $0x1], 0 }
   0x2   :  { %10 = vsyncpa [#allocation6], 0 }
   0x3   :  { %11 = vsyncpa [#allocation4], 0 }
   0x4   :  { %13 = vsyncpa [#allocation4 + $0x1], 0  ;;  %s526_s9 = smov 0   ;;  %s528_s10 = smov 0  }
   0x5   :  { %s530_s11 = smov 0   ;;  %s532_s12 = smov 0  }
   0x6 LB: > { %s547_s13 = sadd.s32 4294967295, %s508_s12   ;;  %s304_s14 = sadd.s32 4294967294, %s508_s12   ;;  %s508_s12 = sphi %s532_s12, %s683_s12   ;;  %s504_s11 = sphi %s530_s11, %s682_s11   ;;  %s500_s10 = sphi %s528_s10, %s681_s10   ;;  %s496_s9 = sphi %s526_s9, %s680_s9  }
   0x7   : > { %p39_p0 = scmp.ne.s32.totalorder %s500_s10, %s496_s9  ;;  %p40_p1 = scmp.eq.s32.totalorder %s547_s13, 0 }
   0x8   : > { %p84_p2 = scmp.eq.s32.totalorder %s547_s13, 1  ;;  %p90_p3 = scmp.eq.s32.totalorder %s304_s14, 1 }
   0x9   : > { %p556_p4 = por %p40_p1, %p39_p0  ;;  %p305_p5 = scmp.ge.s32.totalorder %s508_s12, 1 }
   0xa   : > { %p561_p6 = por %p90_p3, %p39_p0  ;;  %p97_p7 = scmp.lt.s32.totalorder %s508_s12, 3 }
   0xb   : > { %s109_s19 = sshll.u32 %s672_s1, 4  ;;  %s510_s21 = smov [#allocation5]   ;;  %s110_s19 = int_to_ptr.hbm [resolvable:$true] %s109_s19 }
   0xc   : > { %p569_p8 = pnand %p305_p5, %p97_p7  ;;  %s111_s22 = sshll.u32 %s510_s21, 4  ;;  %s112_s22 = int_to_ptr.vmem [resolvable:$true] %s111_s22 }
   0xd   : > { %s579_s23 = sadd.s32 1, %s508_s12   ;;  %s26_s24 = sadd.s32 1, %s504_s11 }
   0xe   : > { %p326_p10 = pneg %p569_p8  ;;  %s23_s25 = ssub.s32 %s508_s12, %s579_s23 }
   0xf   : > { %p24_p12 = scmp.eq.s32.totalorder %s23_s25, 0  ;;  %p33_p13 = scmp.ne.s32.totalorder %s504_s11, %s500_s10 }
  0x10   : > { %p327_p11 = pnand %p326_p10, %p40_p1  ;;  %p34_p0 = scmp.eq.s32.totalorder %s508_s12, 0 }
  0x11   : > { %s588_s26 = scalar_select %p24_p12, %s504_s11, %s26_s24  }
  0x12   : > { %329 = dma.hbm_to_vmem [thread:$0]  (!%p327_p11), %s110_s19, 16, %s112_s22, [#allocation6]  }
  0x13   : > { %p592_p3 = por %p84_p2, %p33_p13  ;;  %p339_p5 = scmp.lt.s32.totalorder %s508_s12, 2 }
  0x14   : > { %s122_s28 = sand.u32 1, %s504_s11   ;;  %s309_s29 = sshll.u32 %s508_s12, 3 }
  0x15   : > { %p35_p7 = por %p34_p0, %p33_p13  ;;  %s308_s30 = sshll.u32 %s122_s28, 3 }
  0x16   : > { %s130_s5 = scalar_lea.hbm %s671_s0, %s309_s29  ;;  %s126_s7 = scalar_lea.vmem [#allocation2], %s308_s30 }
  0x17   : > { %s132_s6 = sshll.u32 %s130_s5, 4  ;;  %s134_s8 = sshll.u32 %s126_s7, 4  ;;  %s133_s6 = int_to_ptr.hbm [resolvable:$true] %s132_s6  ;;  %s135_s8 = int_to_ptr.vmem [resolvable:$true] %s134_s8 }
  0x18   : > { %p602_p10 = pnand %p339_p5, %p35_p7  ;;  %s123_s17 = scalar_lea.sflag [#allocation3], %s122_s28 }
  0x19   : > { %s408_s18 = sshra.s32 %s133_s6, 4  ;;  %s415_s24 = scalar_lea.hbm %s671_s0, 16  ;;  %s409_s18 = int_to_ptr.hbm [resolvable:$true] %s408_s18 }
  0x1a   : > { %s410_s19 = scalar_lea.hbm %s409_s18, 8  ;;  %p412_p11 = pneg %p602_p10 }
  0x1b   : > { %p411_p2 = scmp.ne.s32.totalorder %s409_s18, %s410_s19  ;;  %p416_p0 = scmp.lt.s32.totalorder %s409_s18, %s671_s0 }
  0x1c   : > { %p417_p5 = scmp.lt.s32.totalorder %s415_s24, %s410_s19 }
  0x1d   : > { %p413_p12 = pnand %p412_p11, %p411_p2 }
  0x1e   : > { %p418_p7 = por %p417_p5, %p416_p0 }
  0x1f   : > { %p414_p13 = pneg %p413_p12 }
  0x21   : > { %p419_p9 = pnand %p418_p7, %p414_p13 }
  0x23   : > { %422 = shalt.err (!%p419_p9)
}
  0x24   : > { %333 = dma.hbm_to_vmem [thread:$0]  (!%p602_p10), %s133_s6, 128, %s135_s8, %s123_s17  }
  0x25   : > { %143 = sbr.rel (%p569_p8) target bundleno = 202 (0xca), region = 28  ;;  %s619_s28 = sand.u32 (!%p569_p8), 1, %s500_s10  }
  0x26   : > { %s311_s30 = sshll.u32 (!%p569_p8), %s619_s28, 3  ;;  %s146_s3 = scalar_lea.sflag (!%p569_p8), [#allocation3], %s619_s28 }
  0x27   : > { %s149_s4 = scalar_lea.vmem (!%p569_p8), [#allocation2], %s311_s30 }
  0x2a   : > { %483 = dma.done.wait (%p556_p4), %s146_s3, 128  }
  0x2b   : > { %485 = vsyncadd (%p556_p4), %s146_s3, 4294967168 }
  0x2c   : > { %487 = dma.done.wait (%p40_p1), [#allocation6], 16  }
  0x2d   : > { %489 = vsyncadd (%p40_p1), [#allocation6], 4294967280  ;;  %vm177_vm0 = vcmask 261120   ;;  %v176_v0 = vld [vmem:[%s149_s4] sm:$0xff]  ;;  %s315_s15 = sshll.u32 %s547_s13, 3  ;;  %s175_s7 = scalar_lea.vmem [#allocation7], %s311_s30 }
  0x2e   : > { %v178_v1 = vsel %vm177_vm0, %v176_v0, 0.0  ;;  %v181_v2 = vmul.f32 %v176_v0, %v176_v0  ;;  %s219_s6 = scalar_lea.hbm %s673_s2, %s315_s15  ;;  %v375_v18 = vld [vmem:[#allocation5] ss:$0 sm:$0xff]  ;;  %s221_s8 = sshll.u32 %s175_s7, 4  ;;  %s222_s8 = int_to_ptr.vmem [resolvable:$true] %s221_s8 }
  0x2f   : > { %179 = vadd.xlane.f32.xlu0 %v178_v1  ;;  %s223_s14 = sshll.u32 %s219_s6, 4  ;;  %s209_s13 = scalar_lea.sflag [#allocation4], %s619_s28  ;;  %s224_s14 = int_to_ptr.hbm [resolvable:$true] %s223_s14 }
  0x30   : > { %v182_v3 = vsel %vm177_vm0, %v181_v2, 0.0  ;;  %s452_s17 = sshra.s32 %s224_s14, 4  ;;  %s458_s22 = scalar_lea.hbm %s673_s2, 16  ;;  %s453_s17 = int_to_ptr.hbm [resolvable:$true] %s452_s17 }
  0x31   : > { %s454_s18 = scalar_lea.hbm %s453_s17, 8  ;;  %p459_p9 = scmp.lt.s32.totalorder %s453_s17, %s673_s2 }
  0x32   : > { %p455_p1 = scmp.ne.s32.totalorder %s453_s17, %s454_s18  ;;  %p460_p10 = scmp.lt.s32.totalorder %s458_s22, %s454_s18 }
  0x34   : > { %p456_p4 = pnand %p455_p1, %p592_p3  ;;  %p461_p2 = por %p460_p10, %p459_p9 }
  0x36   : > { %p457_p8 = pneg %p456_p4 }
  0x37   : > { %183 = vadd.xlane.f32.xlu0 %v182_v3 }
  0x38   : > { %p462_p11 = pnand %p461_p2, %p457_p8 }
  0xa2   : > { %v180_v4 = vpop.xlane.xlu0 %179 }
  0xa3   : > { %v185_v5 = vmul.f32 0.03125, %v180_v4 }
  0xa5   : > { %v187_v7 = vmul.f32 %v185_v5, %v185_v5  ;;  %v201_v17 = vsub.f32 %v176_v0, %v185_v5 }
  0xaa   : > { %v184_v6 = vpop.xlane.xlu0 %183 }
  0xab   : > { %v186_v8 = vmul.f32 0.03125, %v184_v6 }
  0xad   : > { %v188_v9 = vsub.f32 %v186_v8, %v187_v7 }
  0xaf   : > { %v189_v10 = vadd.f32 1e-05, %v188_v9 }
  0xb1   : > { %376 = vrsqrt.f32 %v189_v10  ;;  %vm196_vm2 = vweird.f32 %v189_v10 }
  0xb7   : > { %v377_v11 = vpop.eup %376 }
  0xb8   : > { %v191_v12 = vmul.f32 %v377_v11, %v189_v10  ;;  %vm197_vm1 = vweird.f32 %v377_v11 }
  0xb9   : > { %vm198_vm3 = vmor %vm196_vm2, %vm197_vm1 }
  0xba   : > { %v192_v13 = vmul.f32 %v377_v11, %v191_v12 }
  0xbc   : > { %v193_v14 = vmul.f32 0.5, %v192_v13 }
  0xbe   : > { %v194_v15 = vsub.f32 1.5, %v193_v14 }
  0xc0   : > { %v195_v16 = vmul.f32 %v377_v11, %v194_v15 }
  0xc2   : > { %v199_v19 = vsel %vm198_vm3, %v377_v11, %v195_v16 }
  0xc3   : > { %v202_v20 = vmul.f32 %v201_v17, %v199_v19 }
  0xc5   : > { %v206_v21 = vmul.f32 %v375_v18, %v202_v20 }
  0xc7   : > { %207 = vst.msk [vmem:[%s175_s7] sm:$0xff] %vm177_vm0, %v206_v21 }
  0xc8   : > { %465 = shalt.err (!%p462_p11)
}
  0xc9   : > { %324 = dma.vmem_to_hbm [thread:$0]  (%p592_p3), %s222_s8, 128, %s224_s14, %s209_s13  }
  0xca PF: > { %s235_s29 = sand.u32 1, %s496_s9   ;;  %p679_p12 = scmp.ge.s32.totalorder %s508_s12, 2 }
  0xcb   : > { %s236_s28 = scalar_lea.sflag [#allocation4], %s235_s29 }
  0xcc   : > { %p335_p13 = pnand %p679_p12, %p561_p6 }
  0xce   : > { %p336_p0 = pneg %p335_p13 }
  0xd0   : > { %491 = dma.done.wait (%p336_p0), %s236_s28, 128  }
  0xd1   : > { %493 = vsyncadd (%p336_p0), %s236_s28, 4294967168  ;;  %p16_p5 = scmp.ge.s32.totalorder %s579_s23, 4   ;;  %s680_s9 = smov %s500_s10 }
  0xd2   : > { %s681_s10 = smov %s504_s11  ;;  %s682_s11 = smov %s588_s26 }
  0xd3   : > { %s683_s12 = smov %s579_s23  ;;  %18 = sbr.rel (!%p16_p5) target bundleno = 6 (0x6), region = 77 }
  0xd8   :  { %242 = vsyncpa [#allocation3], 1 }
  0xd9   :  { %244 = vsyncpa [#allocation3 + $0x1], 1 }
  0xda   :  { %245 = vsyncpa [#allocation6], 1 }
  0xdb   :  { %246 = vsyncpa [#allocation4], 1 }
  0xdc   :  { %248 = vsyncpa [#allocation4 + $0x1], 1 }

</bundles_post_ra>
